<compile_context>
chip_gen: v7x
topology: tpu7x:2x2x1
jax: 0.10.0
libtpu: 0.0.40
codegen_flags: <defaults>
</compile_context>

<pallas_src>
import functools

import jax
import jax.numpy as jnp
from jax import lax
from jax.experimental import pallas as pl
from jax.experimental.pallas import tpu as pltpu


def _outline_connectivity_kernel(
    x_ref, t_ref, out_ref, inter_acc, st_acc, grad_acc, *, H, W, chunk, n_chunks
):
    # x_ref, t_ref : (bc_tile, H*W) blocks in VMEM (native dtype).
    # out_ref      : (1, 4) f32 in SMEM: per-split (inter, sum(s)+sum(t), grad, 0).
    # *_acc        : (chunk, H*W) f32 VMEM vector accumulators (persist across steps).
    step = pl.program_id(1)
    HW = H * W

    @pl.when(step == 0)
    def _init():
        inter_acc[...] = jnp.zeros_like(inter_acc)
        st_acc[...] = jnp.zeros_like(st_acc)
        grad_acc[...] = jnp.zeros_like(grad_acc)

    # Boundary masks on the flattened H*W (lane) axis.  Hoisted out of the
    # chunk loop (JAX does not CSE broadcast_in_dim).
    j = lax.broadcasted_iota(jnp.int32, (chunk, HW), 1)
    w_mask = (j % W != 0).astype(jnp.float32)   # valid where w != 0
    h_mask = (j >= W).astype(jnp.float32)       # valid where h != 0

    def body(c, carry):
        r = pl.multiple_of(c * chunk, chunk)
        x = x_ref[pl.ds(r, chunk), :].astype(jnp.float32)
        t = t_ref[pl.ds(r, chunk), :].astype(jnp.float32)

        s = jax.nn.sigmoid(x)      # EUP
        ov = s * t                 # overlap = sigmoid(inputs) * targets

        # Dice partials: pure elementwise VMEM accumulation (VPU); the single
        # cross-lane reduction happens once, in the last-step finalize.
        inter_acc[...] += ov
        st_acc[...] += s + t

        # Finite differences via lane rolls (XLU): roll(v,1)[j] = v[j-1]
        # (backward diff along w, valid where w != 0), roll(v,W)[j] = v[j-W]
        # (backward diff along h, valid where h != 0).  non_overlap = s - ov,
        # so its diffs are d_s - d_ov and s*(1-t) is never materialized.
        d_w_ov = ov - pltpu.roll(ov, shift=1, axis=1)
        d_w_s = s - pltpu.roll(s, shift=1, axis=1)
        d_h_ov = ov - pltpu.roll(ov, shift=W, axis=1)
        d_h_s = s - pltpu.roll(s, shift=W, axis=1)

        grad = (
            w_mask * (jnp.abs(d_w_ov) + jnp.abs(d_w_s - d_w_ov))
            + h_mask * (jnp.abs(d_h_ov) + jnp.abs(d_h_s - d_h_ov))
        )
        grad_acc[...] += grad
        return carry

    lax.fori_loop(0, n_chunks, body, 0, unroll=min(n_chunks, 8))

    @pl.when(step == pl.num_programs(1) - 1)
    def _finalize():
        out_ref[0, 0] = jnp.sum(inter_acc[...])
        out_ref[0, 1] = jnp.sum(st_acc[...])
        out_ref[0, 2] = jnp.sum(grad_acc[...])
        out_ref[0, 3] = jnp.float32(0.0)


def _tpu_vmem_bytes():
    try:
        info = pltpu.get_tpu_info()
        return int(getattr(info, "vmem_capacity_bytes", 128 * 1024 * 1024))
    except Exception:
        return 128 * 1024 * 1024


def _pick_bc_tile(BC, HW, itemsize, vmem_limit_bytes):
    # Block sublane dim must be a multiple of 8 or equal the full BC extent.
    if BC % 8 != 0:
        return BC
    # Target ~ vmem_limit/8 per input tile (capped at 8 MiB): 2 inputs x 2
    # pipeline buffers is then at most half the scoped budget, leaving room
    # for the f32 accumulators; in-kernel temporaries are 8-row chunks and
    # stay in vregs regardless of tile size.
    tile_budget = min(vmem_limit_bytes // 8, 8 * 1024 * 1024)
    budget_rows = max(8, (tile_budget // max(1, HW * itemsize)) // 8 * 8)
    best = 8
    d = 8
    while d <= BC:
        if BC % d == 0 and d <= budget_rows:
            best = d
        d += 8
    return best


def outline_connectivity_loss(
    inputs, targets, smooth=1.0, connectivity_weight=0.1, bc_tile=None
):
    """inputs, targets: (B, C, H, W) arrays (NCHW, matching the PyTorch module)."""
    B, C, H, W = inputs.shape
    BC, HW = B * C, H * W

    # Metadata-only reshape; keep native dtypes (cast to f32 inside the
    # kernel), so bf16 / int8 inputs only move bf16 / int8 bytes over HBM.
    x = inputs.reshape(BC, HW)
    t = targets.reshape(BC, HW)

    # Generation-aware scoped-VMEM budget: 128 MiB physical on v5e/v6e, 64 MiB on v7x.
    vmem_cap = _tpu_vmem_bytes()
    vmem_limit = (
        64 * 1024 * 1024 if vmem_cap >= 128 * 1024 * 1024 else 32 * 1024 * 1024
    )

    if bc_tile is None:
        bc_tile = _pick_bc_tile(
            BC, HW, max(x.dtype.itemsize, t.dtype.itemsize), vmem_limit
        )
    assert BC % bc_tile == 0, (BC, bc_tile)

    total_steps = BC // bc_tile
    # Leading "parallel" axis of size 2 lets v7x shard the loss across its two
    # TensorCores; on single-TC v5e/v6e it is just a harmless outer loop level.
    n_split = 2 if (total_steps % 2 == 0 and total_steps >= 2) else 1
    steps_per_split = total_steps // n_split

    chunk = 8 if bc_tile % 8 == 0 else bc_tile
    n_chunks = bc_tile // chunk

    kernel = functools.partial(
        _outline_connectivity_kernel, H=H, W=W, chunk=chunk, n_chunks=n_chunks
    )

    parts = pl.pallas_call(
        kernel,
        out_shape=jax.ShapeDtypeStruct((n_split, 4), jnp.float32),
        grid_spec=pltpu.PrefetchScalarGridSpec(
            num_scalar_prefetch=0,
            grid=(n_split, steps_per_split),
            in_specs=[
                pl.BlockSpec((bc_tile, HW), lambda c, i: (c * steps_per_split + i, 0)),
                pl.BlockSpec((bc_tile, HW), lambda c, i: (c * steps_per_split + i, 0)),
            ],
            out_specs=pl.BlockSpec(
                (1, 4), lambda c, i: (c, 0), memory_space=pltpu.MemorySpace.SMEM
            ),
            scratch_shapes=[
                pltpu.VMEM((chunk, HW), jnp.float32),  # intersection accumulator
                pltpu.VMEM((chunk, HW), jnp.float32),  # s + t accumulator
                pltpu.VMEM((chunk, HW), jnp.float32),  # abs-gradient accumulator
            ],
        ),
        compiler_params=pltpu.CompilerParams(
            dimension_semantics=("parallel", "arbitrary"),
            vmem_limit_bytes=vmem_limit,
        ),
    )(x, t)

    # Tiny JAX epilogue: combine per-split partial sums, then dice + penalty.
    inter = jnp.sum(parts[:, 0])
    s_plus_t = jnp.sum(parts[:, 1])
    grad = jnp.sum(parts[:, 2])
    numel = jnp.float32(B * C * H * W)
    dice = 1.0 - (2.0 * inter + smooth) / (s_plus_t + smooth)
    return dice + connectivity_weight * (grad / numel)


def _reference_loss(inputs, targets, smooth=1.0, connectivity_weight=0.1):
    """Pure-JAX reference mirroring the PyTorch forward, for a sanity check."""
    s = jax.nn.sigmoid(inputs.astype(jnp.float32))
    t = targets.astype(jnp.float32)
    inter = jnp.sum(s * t)
    dice = 1.0 - (2.0 * inter + smooth) / (jnp.sum(s) + jnp.sum(t) + smooth)
    ov = s * t
    nov = s * (1.0 - t)
    gh_o = jnp.sum(jnp.abs(ov[:, :, 1:, :] - ov[:, :, :-1, :]))
    gw_o = jnp.sum(jnp.abs(ov[:, :, :, 1:] - ov[:, :, :, :-1]))
    gh_n = jnp.sum(jnp.abs(nov[:, :, 1:, :] - nov[:, :, :-1, :]))
    gw_n = jnp.sum(jnp.abs(nov[:, :, :, 1:] - nov[:, :, :, :-1]))
    numel = s.size
    penalty = (gh_o + gw_o) / numel + (gh_n + gw_n) / numel
    return dice + connectivity_weight * penalty


if __name__ == "__main__":
    key = jax.random.PRNGKey(0)
    k1, k2, k3, k4 = jax.random.split(key, 4)

    # Case 1: small NCHW logits / masks (single grid step, single split).
    B, C, H, W = 2, 4, 16, 16
    inputs = jax.random.normal(k1, (B, C, H, W), dtype=jnp.float32)
    targets = jax.random.bernoulli(k2, 0.5, (B, C, H, W)).astype(jnp.float32)
    loss = jax.block_until_ready(outline_connectivity_loss(inputs, targets))
    ref = jax.block_until_ready(_reference_loss(inputs, targets))
    assert jnp.allclose(loss, ref, atol=1e-4, rtol=1e-4), (loss, ref)

    # Case 2: BC=32 with bc_tile=8 -> grid (2, 2): exercises the 2-way split,
    # multi-step VMEM accumulation, last-step finalize, and the JAX epilogue.
    B2, C2 = 4, 8
    inputs2 = jax.random.normal(k3, (B2, C2, H, W), dtype=jnp.float32)
    targets2 = jax.random.bernoulli(k4, 0.5, (B2, C2, H, W)).astype(jnp.float32)
    loss2 = jax.block_until_ready(
        outline_connectivity_loss(inputs2, targets2, bc_tile=8)
    )
    ref2 = jax.block_until_ready(_reference_loss(inputs2, targets2))
    assert jnp.allclose(loss2, ref2, atol=1e-4, rtol=1e-4), (loss2, ref2)

    # Case 3: bf16 inputs at the call site (half the HBM bytes); the kernel
    # upcasts to f32 internally, compared against the reference evaluated on
    # the same bf16-quantized values.
    inputs3 = inputs2.astype(jnp.bfloat16)
    targets3 = targets2.astype(jnp.bfloat16)
    loss3 = jax.block_until_ready(outline_connectivity_loss(inputs3, targets3))
    ref3 = jax.block_until_ready(_reference_loss(inputs3, targets3))
    assert jnp.allclose(loss3, ref3, atol=1e-4, rtol=1e-4), (loss3, ref3)

    print("KERNEL_OK")
</pallas_src>

<mosaic_0001>
module attributes {stable_mosaic.version = 11 : i64} {
  func.func @_outline_connectivity_kernel(%arg0: i32, %arg1: i32, %arg2: memref<8x256xf32, #tpu.memory_space<vmem>>, %arg3: memref<8x256xf32, #tpu.memory_space<vmem>>, %arg4: memref<1x4xf32, #tpu.memory_space<smem>>, %arg5: memref<8x256xf32, #tpu.memory_space<vmem>>, %arg6: memref<8x256xf32, #tpu.memory_space<vmem>>, %arg7: memref<8x256xf32, #tpu.memory_space<vmem>>) attributes {dimension_semantics = [#tpu.dimension_semantics<parallel>, #tpu.dimension_semantics<arbitrary>], iteration_bounds = array<i64: 1, 1>, scalar_prefetch = 0 : i64, scratch_operands = 3 : i64, tpu.core_type = #tpu.core_type<tc>, window_params = [{transform_indices = @transform_0, window_bounds = array<i64: 8, 256>}, {transform_indices = @transform_1, window_bounds = array<i64: 8, 256>}, {transform_indices = @transform_2, window_bounds = array<i64: 1, 4>}]} {
    %c0_i32 = arith.constant 0 : i32
    %0 = arith.cmpi eq, %arg1, %c0_i32 : i32
    %1 = arith.extui %0 : i1 to i32
    %c0_i32_0 = arith.constant 0 : i32
    %2 = arith.cmpi ne, %1, %c0_i32_0 : i32
    scf.if %2 {
      %cst_28 = arith.constant 0.000000e+00 : f32
      %72 = vector.broadcast %cst_28 : f32 to vector<8x256xf32>
      %c0_29 = arith.constant 0 : index
      %c0_30 = arith.constant 0 : index
      %73 = vector.load %arg5[%c0_29, %c0_30] : memref<8x256xf32, #tpu.memory_space<vmem>>, vector<8x256xf32>
      tpu.vector_store %arg5[%c0_29, %c0_30], %72 {strides = array<i32>} : memref<8x256xf32, #tpu.memory_space<vmem>>, vector<8x256xf32>,
      %cst_31 = arith.constant 0.000000e+00 : f32
      %74 = vector.broadcast %cst_31 : f32 to vector<8x256xf32>
      %c0_32 = arith.constant 0 : index
      %c0_33 = arith.constant 0 : index
      %75 = vector.load %arg6[%c0_32, %c0_33] : memref<8x256xf32, #tpu.memory_space<vmem>>, vector<8x256xf32>
      tpu.vector_store %arg6[%c0_32, %c0_33], %74 {strides = array<i32>} : memref<8x256xf32, #tpu.memory_space<vmem>>, vector<8x256xf32>,
      %cst_34 = arith.constant 0.000000e+00 : f32
      %76 = vector.broadcast %cst_34 : f32 to vector<8x256xf32>
      %c0_35 = arith.constant 0 : index
      %c0_36 = arith.constant 0 : index
      %77 = vector.load %arg7[%c0_35, %c0_36] : memref<8x256xf32, #tpu.memory_space<vmem>>, vector<8x256xf32>
      tpu.vector_store %arg7[%c0_35, %c0_36], %76 {strides = array<i32>} : memref<8x256xf32, #tpu.memory_space<vmem>>, vector<8x256xf32>,
    } else {
    }
    %3 = tpu.iota {dimensions = array<i32: 1>} : vector<8x256xi32>
    %c16_i32 = arith.constant 16 : i32
    %c0_i32_1 = arith.constant 0 : i32
    %4 = arith.cmpi eq, %c16_i32, %c0_i32_1 : i32
    %c1_i32 = arith.constant 1 : i32
    %5 = arith.select %4, %c1_i32, %c16_i32 : i32
    %6 = vector.broadcast %5 : i32 to vector<8x256xi32>
    %7 = arith.remsi %3, %6 : vector<8x256xi32>
    %c0_i32_2 = arith.constant 0 : i32
    %8 = vector.broadcast %c0_i32_2 : i32 to vector<8x256xi32>
    %9 = arith.cmpi ne, %7, %8 : vector<8x256xi32>
    %c0_i32_3 = arith.constant 0 : i32
    %10 = vector.broadcast %c0_i32_3 : i32 to vector<8x256xi32>
    %11 = arith.cmpi slt, %7, %10 : vector<8x256xi32>
    %c0_i32_4 = arith.constant 0 : i32
    %12 = arith.cmpi slt, %5, %c0_i32_4 : i32
    %13 = vector.broadcast %12 : i1 to vector<8x256xi1>
    %14 = vector.broadcast %13 : vector<8x256xi1> to vector<8x256xi1>
    %15 = arith.xori %11, %14 : vector<8x256xi1>
    %16 = arith.andi %15, %9 : vector<8x256xi1>
    %17 = vector.broadcast %5 : i32 to vector<8x256xi32>
    %18 = arith.addi %7, %17 : vector<8x256xi32>
    %19 = arith.select %16, %18, %7 : vector<8x256xi1>, vector<8x256xi32>
    %c0_i32_5 = arith.constant 0 : i32
    %20 = vector.broadcast %c0_i32_5 : i32 to vector<8x256xi32>
    %21 = arith.cmpi ne, %19, %20 : vector<8x256xi32>
    %22 = arith.extui %21 : vector<8x256xi1> to vector<8x256xi32>
    %23 = arith.sitofp %22 : vector<8x256xi32> to vector<8x256xf32>
    %c16_i32_6 = arith.constant 16 : i32
    %24 = vector.broadcast %c16_i32_6 : i32 to vector<8x256xi32>
    %25 = arith.cmpi sge, %3, %24 : vector<8x256xi32>
    %26 = arith.extui %25 : vector<8x256xi1> to vector<8x256xi32>
    %27 = arith.sitofp %26 : vector<8x256xi32> to vector<8x256xf32>
    %c0_i32_7 = arith.constant 0 : i32
    %c8_i32 = arith.constant 8 : i32
    %28 = arith.muli %c0_i32_7, %c8_i32 : i32
    %29 = tpu.assume_multiple %28, 8 : i32
    %30 = arith.index_cast %29 : i32 to index
    %c0 = arith.constant 0 : index
    %31 = vector.load %arg2[%30, %c0] : memref<8x256xf32, #tpu.memory_space<vmem>>, vector<8x256xf32>
    %32 = arith.index_cast %29 : i32 to index
    %c0_8 = arith.constant 0 : index
    %33 = vector.load %arg3[%32, %c0_8] : memref<8x256xf32, #tpu.memory_space<vmem>>, vector<8x256xf32>
    %34 = arith.negf %31 : vector<8x256xf32>
    %35 = math.exp %34 : vector<8x256xf32>
    %cst = arith.constant 1.000000e+00 : f32
    %36 = vector.broadcast %cst : f32 to vector<8x256xf32>
    %37 = arith.addf %36, %35 : vector<8x256xf32>
    %38 = arith.divf %36, %37 : vector<8x256xf32>
    %39 = arith.mulf %38, %33 : vector<8x256xf32>
    %c0_9 = arith.constant 0 : index
    %c0_10 = arith.constant 0 : index
    %40 = vector.load %arg5[%c0_9, %c0_10] : memref<8x256xf32, #tpu.memory_space<vmem>>, vector<8x256xf32>
    %41 = arith.addf %40, %39 : vector<8x256xf32>
    %c0_11 = arith.constant 0 : index
    %c0_12 = arith.constant 0 : index
    %42 = vector.load %arg5[%c0_11, %c0_12] : memref<8x256xf32, #tpu.memory_space<vmem>>, vector<8x256xf32>
    tpu.vector_store %arg5[%c0_11, %c0_12], %41 {strides = array<i32>} : memref<8x256xf32, #tpu.memory_space<vmem>>, vector<8x256xf32>,
    %c0_13 = arith.constant 0 : index
    %c0_14 = arith.constant 0 : index
    %43 = vector.load %arg6[%c0_13, %c0_14] : memref<8x256xf32, #tpu.memory_space<vmem>>, vector<8x256xf32>
    %44 = arith.addf %38, %33 : vector<8x256xf32>
    %45 = arith.addf %43, %44 : vector<8x256xf32>
    %c0_15 = arith.constant 0 : index
    %c0_16 = arith.constant 0 : index
    %46 = vector.load %arg6[%c0_15, %c0_16] : memref<8x256xf32, #tpu.memory_space<vmem>>, vector<8x256xf32>
    tpu.vector_store %arg6[%c0_15, %c0_16], %45 {strides = array<i32>} : memref<8x256xf32, #tpu.memory_space<vmem>>, vector<8x256xf32>,
    %c1_i32_17 = arith.constant 1 : i32
    %47 = tpu.dynamic_rotate %39 by %c1_i32_17 dim 1 : vector<8x256xf32>, i32 -> vector<8x256xf32>
    %48 = arith.subf %39, %47 : vector<8x256xf32>
    %c1_i32_18 = arith.constant 1 : i32
    %49 = tpu.dynamic_rotate %38 by %c1_i32_18 dim 1 : vector<8x256xf32>, i32 -> vector<8x256xf32>
    %50 = arith.subf %38, %49 : vector<8x256xf32>
    %c16_i32_19 = arith.constant 16 : i32
    %51 = tpu.dynamic_rotate %39 by %c16_i32_19 dim 1 : vector<8x256xf32>, i32 -> vector<8x256xf32>
    %52 = arith.subf %39, %51 : vector<8x256xf32>
    %c16_i32_20 = arith.constant 16 : i32
    %53 = tpu.dynamic_rotate %38 by %c16_i32_20 dim 1 : vector<8x256xf32>, i32 -> vector<8x256xf32>
    %54 = arith.subf %38, %53 : vector<8x256xf32>
    %55 = math.absf %48 : vector<8x256xf32>
    %56 = arith.subf %50, %48 : vector<8x256xf32>
    %57 = math.absf %56 : vector<8x256xf32>
    %58 = arith.addf %55, %57 : vector<8x256xf32>
    %59 = arith.mulf %23, %58 : vector<8x256xf32>
    %60 = math.absf %52 : vector<8x256xf32>
    %61 = arith.subf %54, %52 : vector<8x256xf32>
    %62 = math.absf %61 : vector<8x256xf32>
    %63 = arith.addf %60, %62 : vector<8x256xf32>
    %64 = arith.mulf %27, %63 : vector<8x256xf32>
    %65 = arith.addf %59, %64 : vector<8x256xf32>
    %c0_21 = arith.constant 0 : index
    %c0_22 = arith.constant 0 : index
    %66 = vector.load %arg7[%c0_21, %c0_22] : memref<8x256xf32, #tpu.memory_space<vmem>>, vector<8x256xf32>
    %67 = arith.addf %66, %65 : vector<8x256xf32>
    %c0_23 = arith.constant 0 : index
    %c0_24 = arith.constant 0 : index
    %68 = vector.load %arg7[%c0_23, %c0_24] : memref<8x256xf32, #tpu.memory_space<vmem>>, vector<8x256xf32>
    tpu.vector_store %arg7[%c0_23, %c0_24], %67 {strides = array<i32>} : memref<8x256xf32, #tpu.memory_space<vmem>>, vector<8x256xf32>,
    %c1_i32_25 = arith.constant 1 : i32
    %c0_i32_26 = arith.constant 0 : i32
    %69 = arith.cmpi eq, %arg1, %c0_i32_26 : i32
    %70 = arith.extui %69 : i1 to i32
    %c0_i32_27 = arith.constant 0 : i32
    %71 = arith.cmpi ne, %70, %c0_i32_27 : i32
    scf.if %71 {
      %c0_28 = arith.constant 0 : index
      %c0_29 = arith.constant 0 : index
      %72 = vector.load %arg5[%c0_28, %c0_29] : memref<8x256xf32, #tpu.memory_space<vmem>>, vector<8x256xf32>
      %73 = vector.shape_cast %72 : vector<8x256xf32> to vector<1x8x256xf32>
      %cst_30 = arith.constant dense<0.000000e+00> : vector<1xf32>
      %74 = vector.multi_reduction <add>, %73, %cst_30 [1, 2] : vector<1x8x256xf32> to vector<1xf32>
      %75 = vector.shape_cast %74 : vector<1xf32> to vector<1x1x1xf32>
      %76 = vector.extract %75[0, 0, 0] : f32 from vector<1x1x1xf32>
      %c0_31 = arith.constant 0 : index
      %c0_32 = arith.constant 0 : index
      %77 = memref.load %arg4[%c0_31, %c0_32] : memref<1x4xf32, #tpu.memory_space<smem>>
      memref.store %76, %arg4[%c0_31, %c0_32] : memref<1x4xf32, #tpu.memory_space<smem>>
      %c0_33 = arith.constant 0 : index
      %c0_34 = arith.constant 0 : index
      %78 = vector.load %arg6[%c0_33, %c0_34] : memref<8x256xf32, #tpu.memory_space<vmem>>, vector<8x256xf32>
      %79 = vector.shape_cast %78 : vector<8x256xf32> to vector<1x8x256xf32>
      %cst_35 = arith.constant dense<0.000000e+00> : vector<1xf32>
      %80 = vector.multi_reduction <add>, %79, %cst_35 [1, 2] : vector<1x8x256xf32> to vector<1xf32>
      %81 = vector.shape_cast %80 : vector<1xf32> to vector<1x1x1xf32>
      %82 = vector.extract %81[0, 0, 0] : f32 from vector<1x1x1xf32>
      %c0_36 = arith.constant 0 : index
      %c1 = arith.constant 1 : index
      %83 = memref.load %arg4[%c0_36, %c1] : memref<1x4xf32, #tpu.memory_space<smem>>
      memref.store %82, %arg4[%c0_36, %c1] : memref<1x4xf32, #tpu.memory_space<smem>>
      %c0_37 = arith.constant 0 : index
      %c0_38 = arith.constant 0 : index
      %84 = vector.load %arg7[%c0_37, %c0_38] : memref<8x256xf32, #tpu.memory_space<vmem>>, vector<8x256xf32>
      %85 = vector.shape_cast %84 : vector<8x256xf32> to vector<1x8x256xf32>
      %cst_39 = arith.constant dense<0.000000e+00> : vector<1xf32>
      %86 = vector.multi_reduction <add>, %85, %cst_39 [1, 2] : vector<1x8x256xf32> to vector<1xf32>
      %87 = vector.shape_cast %86 : vector<1xf32> to vector<1x1x1xf32>
      %88 = vector.extract %87[0, 0, 0] : f32 from vector<1x1x1xf32>
      %c0_40 = arith.constant 0 : index
      %c2 = arith.constant 2 : index
      %89 = memref.load %arg4[%c0_40, %c2] : memref<1x4xf32, #tpu.memory_space<smem>>
      memref.store %88, %arg4[%c0_40, %c2] : memref<1x4xf32, #tpu.memory_space<smem>>
      %cst_41 = arith.constant 0.000000e+00 : f32
      %c0_42 = arith.constant 0 : index
      %c3 = arith.constant 3 : index
      %90 = memref.load %arg4[%c0_42, %c3] : memref<1x4xf32, #tpu.memory_space<smem>>
      memref.store %cst_41, %arg4[%c0_42, %c3] : memref<1x4xf32, #tpu.memory_space<smem>>
    } else {
    }
    return
  }
  func.func @transform_0(%arg0: i32, %arg1: i32) -> (i32, i32) {
    %c1_i32 = arith.constant 1 : i32
    %0 = arith.muli %arg0, %c1_i32 : i32
    %1 = arith.addi %0, %arg1 : i32
    %c0_i32 = arith.constant 0 : i32
    %c0_i32_0 = arith.constant 0 : i32
    return %1, %c0_i32 : i32, i32
  }
  func.func @transform_1(%arg0: i32, %arg1: i32) -> (i32, i32) {
    %c1_i32 = arith.constant 1 : i32
    %0 = arith.muli %arg0, %c1_i32 : i32
    %1 = arith.addi %0, %arg1 : i32
    %c0_i32 = arith.constant 0 : i32
    %c0_i32_0 = arith.constant 0 : i32
    return %1, %c0_i32 : i32, i32
  }
  func.func @transform_2(%arg0: i32, %arg1: i32) -> (i32, i32) {
    %c0_i32 = arith.constant 0 : i32
    %c0_i32_0 = arith.constant 0 : i32
    return %arg0, %c0_i32 : i32, i32
  }
}

</mosaic_0001>

<bundles_post_ra>
// kernel: tpu_custom_call.1
= control target key start
LH: loop header
LB: loop body
LE: loop exit
PB: predicated region body
PF: predicated region fallthrough
CT: control target
= control target key end

     0   :  { %7 = vsyncpa [#allocation6], 0  ;;  %s400_s0 = inlined_call_operand.hbm [shape: f32[8,256], index: 0, kind: input, shape index: {}]   ;;  %s401_s1 = inlined_call_operand.hbm [shape: f32[8,256], index: 1, kind: input, shape index: {}]   ;;  %s402_s2 = inlined_call_operand.hbm [shape: f32[1,4], index: 2, kind: output, shape index: {}]  }
   0x1   :  { %8 = vsyncpa [#allocation9], 0 }
   0x2   :  { %9 = vsyncpa [#allocation7], 0  ;;  %s342_s9 = smov [#allocation5]   ;;  %s343_s11 = smov [#allocation8]  }
   0x3   :  { %s20_s10 = sshll.u32 %s342_s9, 4  ;;  %s34_s12 = sshll.u32 %s343_s11, 4  ;;  %s21_s10 = int_to_ptr.vmem [resolvable:$true] %s20_s10  ;;  %s35_s12 = int_to_ptr.vmem [resolvable:$true] %s34_s12 }
   0x4   :  { %s282_s15 = scalar_lea.hbm %s400_s0, 256 }
   0x5   :  { %p283_p0 = scmp.ne.s32.totalorder %s400_s0, %s282_s15  ;;  %p286_p1 = scmp.lt.u32.totalorder %s282_s15, %s400_s0 }
   0x7   :  { %p288_p2 = pnand %p286_p1, %p283_p0 }
   0x9   :  { %291 = shalt.err (!%p288_p2)
}
   0xa   :  { %s292_s20 = scalar_lea.vmem %s21_s10, 256  ;;  %p297_p4 = scmp.lt.s32.totalorder %s21_s10, %s21_s10 }
   0xb   :  { %p293_p3 = scmp.ne.s32.totalorder %s21_s10, %s292_s20  ;;  %p298_p5 = scmp.lt.s32.totalorder %s292_s20, %s292_s20 }
   0xd   :  { %p299_p6 = por %p298_p5, %p297_p4 }
   0xf   :  { %p300_p7 = pnand %p299_p6, %p293_p3 }
  0x11   :  { %303 = shalt.err (!%p300_p7)
}
  0x12   :  { %23 = dma.hbm_to_vmem [thread:$0]  %s400_s0, 256, %s21_s10, [#allocation6]  }
  0x13   :  { %s304_s25 = scalar_lea.hbm %s401_s1, 256 }
  0x14   :  { %p305_p8 = scmp.ne.s32.totalorder %s401_s1, %s304_s25  ;;  %p308_p9 = scmp.lt.u32.totalorder %s304_s25, %s401_s1 }
  0x16   :  { %p310_p10 = pnand %p308_p9, %p305_p8 }
  0x18   :  { %313 = shalt.err (!%p310_p10)
}
  0x19   :  { %s314_s30 = scalar_lea.vmem %s35_s12, 256  ;;  %p319_p12 = scmp.lt.s32.totalorder %s35_s12, %s35_s12 }
  0x1a   :  { %p315_p11 = scmp.ne.s32.totalorder %s35_s12, %s314_s30  ;;  %p320_p13 = scmp.lt.s32.totalorder %s314_s30, %s314_s30 }
  0x1c   :  { %p321_p0 = por %p320_p13, %p319_p12 }
  0x1e   :  { %p322_p1 = pnand %p321_p0, %p315_p11 }
  0x20   :  { %325 = shalt.err (!%p322_p1)
}
  0x21   :  { %37 = dma.hbm_to_vmem [thread:$0]  %s401_s1, 256, %s35_s12, [#allocation9]  }
  0x22   :  { %336 = dma.done.wait [#allocation6], 256  }
  0x23   :  { %337 = vsyncadd [#allocation6], 4294967040 }
  0x24   :  { %338 = dma.done.wait [#allocation9], 256  }
  0x25   :  { %339 = vsyncadd [#allocation9], 4294967040  ;;  %v98_v0 = vld [vmem:[#allocation5] sm:$0xff]  ;;  %v99_v1 = vld [vmem:[#allocation5 + $0x8] sm:$0xff]  ;;  %s344_s1 = smov 1   ;;  %s345_s4 = smov 16   ;;  %v56_v18 = vlaneseq }
  0x26   :  { %v259_v2 = vmul.f32 -1.442695, %v98_v0  ;;  %v260_v3 = vmul.f32 -1.442695, %v99_v1  ;;  %v102_v8 = vld [vmem:[#allocation8] sm:$0xff]  ;;  %v103_v10 = vld [vmem:[#allocation8 + $0x8] sm:$0xff] }
  0x27   :  { %v57_v19 = vand.u32 127, %v56_v18  ;;  %v346_v61 = vmov 0.0   ;;  %s347_s5 = smov 0.0   ;;  %s326_s11 = scalar_lea.hbm %s402_s2, 16 }
  0x28   :  { %274 = vpow2.f32 %v259_v2  ;;  %240 = sst [smem:[#allocation10 + $0x3]] %s347_s5  ;;  %p327_p2 = scmp.ne.s32.totalorder %s402_s2, %s326_s11 }
  0x29   :  { %276 = vpow2.f32 %v260_v3  ;;  %vm136_vm0 = vcmp.lt.s32.totalorder %v57_v19, 1  ;;  %vm153_vm1 = vcmp.lt.s32.totalorder %v57_v19, 16  ;;  %v58_v32 = vadd.s32 128, %v57_v19  ;;  %p330_p3 = scmp.lt.u32.totalorder %s326_s11, %s402_s2 }
  0x2a   :  { %v63_v40 = vand.u32 15, %v57_v19  ;;  %vm89_vm4 = vcmp.ge.s32.totalorder %v57_v19, 16 }
  0x2b   :  { %v70_v41 = vand.u32 15, %v58_v32  ;;  %v258_v0 = vsel %vm89_vm4, 1.0, %v346_v61  ;;  %p332_p4 = pnand %p330_p3, %p327_p2 }
  0x2c   :  { %vm83_vm2 = vcmp.ne.s32.totalorder %v63_v40, 0 }
  0x2d   :  { %vm84_vm3 = vcmp.ne.s32.totalorder %v70_v41, 0  ;;  %v256_v62 = vsel %vm83_vm2, 1.0, %v346_v61 }
  0x2e   :  { %v257_v63 = vsel %vm84_vm3, 1.0, %v346_v61 }
  0x32   :  { %v275_v4 = vpop.eup %274 }
  0x33   :  { %v277_v5 = vpop.eup %276  ;;  %v110_v6 = vadd.f32 1.0, %v275_v4 }
  0x34   :  { %v111_v7 = vadd.f32 1.0, %v277_v5 }
  0x35   :  { %278 = vrcp.f32 %v110_v6 }
  0x36   :  { %280 = vrcp.f32 %v111_v7 }
  0x3f   :  { %v279_v9 = vpop.eup %278 }
  0x40   :  { %v281_v11 = vpop.eup %280  ;;  %141 = vrot.lane.b32.xlu1 %v279_v9, %s344_s1  ;;  %v116_v12 = vmul.f32 %v279_v9, %v102_v8  ;;  %v126_v14 = vadd.f32 %v279_v9, %v102_v8 }
  0x41   :  { %v117_v13 = vmul.f32 %v281_v11, %v103_v10  ;;  %v127_v15 = vadd.f32 %v281_v11, %v103_v10 }
  0x42   :  { %132 = vrot.lane.b32.xlu0 %v116_v12, %s344_s1 }
  0x43   :  { %v199_v16 = vadd.f32 %v117_v13, %v116_v12  ;;  %v213_v17 = vadd.f32 %v127_v15, %v126_v14 }
  0x44   :  { %143 = vrot.lane.b32.xlu1 %v281_v11, %s344_s1 }
  0x46   :  { %134 = vrot.lane.b32.xlu0 %v117_v13, %s344_s1 }
  0x48   :  { %151 = vrot.lane.b32.xlu1 %v117_v13, %s345_s4 }
  0x4a   :  { %149 = vrot.lane.b32.xlu0 %v116_v12, %s345_s4 }
  0x4c   :  { %160 = vrot.lane.b32.xlu1 %v281_v11, %s345_s4 }
  0x4e   :  { %158 = vrot.lane.b32.xlu0 %v279_v9, %s345_s4 }
  0x6d   :  { %200 = vadd.xlane.f32.xlu0 %v199_v16 }
  0x70   :  { %214 = vadd.xlane.f32.xlu1 %v213_v17 }
  0xb2   :  { %v142_v20 = vpop.permute.xlu1 %141 }
  0xb4   :  { %v133_v21 = vpop.permute.xlu0 %132 }
  0xb6   :  { %v144_v22 = vpop.permute.xlu1 %143 }
  0xb7   :  { %v146_v23 = vsel %vm136_vm0, %v144_v22, %v142_v20  ;;  %v145_v25 = vsel %vm136_vm0, %v142_v20, %v144_v22 }
  0xb8   :  { %v135_v24 = vpop.permute.xlu0 %134  ;;  %v147_v31 = vsub.f32 %v279_v9, %v146_v23  ;;  %v148_v33 = vsub.f32 %v281_v11, %v145_v25 }
  0xb9   :  { %v137_v26 = vsel %vm136_vm0, %v133_v21, %v135_v24  ;;  %v138_v27 = vsel %vm136_vm0, %v135_v24, %v133_v21 }
  0xba   :  { %v139_v28 = vsub.f32 %v116_v12, %v138_v27  ;;  %v140_v29 = vsub.f32 %v117_v13, %v137_v26  ;;  %v152_v30 = vpop.permute.xlu1 %151 }
  0xbc   :  { %v150_v34 = vpop.permute.xlu0 %149  ;;  %v168_v35 = vsub.f32 %v147_v31, %v139_v28  ;;  %v169_v36 = vsub.f32 %v148_v33, %v140_v29  ;;  %v166_v51 = vand.u32 2147483647, %v139_v28  ;;  %v167_v52 = vand.u32 2147483647, %v140_v29 }
  0xbd   :  { %v155_v37 = vsel %vm153_vm1, %v152_v30, %v150_v34  ;;  %v154_v39 = vsel %vm153_vm1, %v150_v34, %v152_v30 }
  0xbe   :  { %v161_v38 = vpop.permute.xlu1 %160  ;;  %v170_v43 = vand.u32 2147483647, %v168_v35  ;;  %v156_v44 = vsub.f32 %v116_v12, %v155_v37  ;;  %v171_v47 = vand.u32 2147483647, %v169_v36  ;;  %v157_v48 = vsub.f32 %v117_v13, %v154_v39 }
  0xc0   :  { %v159_v42 = vpop.permute.xlu0 %158  ;;  %v172_v55 = vadd.f32 %v170_v43, %v166_v51  ;;  %v176_v56 = vand.u32 2147483647, %v156_v44  ;;  %v173_v57 = vadd.f32 %v171_v47, %v167_v52  ;;  %v177_v58 = vand.u32 2147483647, %v157_v48 }
  0xc1   :  { %v162_v45 = vsel %vm153_vm1, %v159_v42, %v161_v38  ;;  %v163_v46 = vsel %vm153_vm1, %v161_v38, %v159_v42 }
  0xc2   :  { %v164_v49 = vsub.f32 %v279_v9, %v163_v46  ;;  %v165_v50 = vsub.f32 %v281_v11, %v162_v45  ;;  %v174_v3 = vmul.f32 %v256_v62, %v172_v55  ;;  %v175_v4 = vmul.f32 %v257_v63, %v173_v57 }
  0xc4   :  { %v178_v53 = vsub.f32 %v164_v49, %v156_v44  ;;  %v179_v54 = vsub.f32 %v165_v50, %v157_v48 }
  0xc6   :  { %v180_v59 = vand.u32 2147483647, %v178_v53  ;;  %v181_v60 = vand.u32 2147483647, %v179_v54 }
  0xc8   :  { %v182_v1 = vadd.f32 %v180_v59, %v176_v56  ;;  %v183_v2 = vadd.f32 %v181_v60, %v177_v58 }
  0xca   :  { %v184_v5 = vmul.f32 %v258_v0, %v182_v1  ;;  %v187_v7 = vadd.f32 %v183_v2, %v175_v4 }
  0xcc   :  { %v186_v6 = vadd.f32 %v184_v5, %v174_v3 }
  0xce   :  { %v227_v8 = vadd.f32 %v187_v7, %v186_v6 }
  0xd0   :  { %228 = vadd.xlane.f32.xlu0 %v227_v8 }
  0xfa   :  { %v201_v9 = vpop.xlane.xlu0 %200 }
  0xfb   :  { %v202_v10 = vrot.slane %v201_v9, 4 }
  0xfd   :  { %v203_v11 = vadd.f32 %v202_v10, %v201_v9  ;;  %v215_v12 = vpop.xlane.xlu1 %214 }
  0xfe   :  { %v216_v13 = vrot.slane %v215_v12, 4 }
  0xff   :  { %v204_v14 = vrot.slane %v203_v11, 2 }
 0x100   :  { %v217_v15 = vadd.f32 %v216_v13, %v215_v12 }
 0x101   :  { %v205_v16 = vadd.f32 %v204_v14, %v203_v11 }
 0x102   :  { %v218_v17 = vrot.slane %v217_v15, 2 }
 0x103   :  { %v206_v18 = vrot.slane %v205_v16, 1 }
 0x104   :  { %v219_v19 = vadd.f32 %v218_v17, %v217_v15 }
 0x105   :  { %v207_v20 = vadd.f32 %v206_v18, %v205_v16 }
 0x106   :  { %v220_v21 = vrot.slane %v219_v19, 1 }
 0x107   :  { %261 = vpush %v207_v20 }
 0x108   :  { %v221_v22 = vadd.f32 %v220_v21, %v219_v19 }
 0x10a   :  { %263 = vpush %v221_v22 }
 0x138   :  { %s262_s6 = spop %261 }
 0x139   :  { %210 = sst [smem:[#allocation10]] %s262_s6 }
 0x13b   :  { %s264_s7 = spop %263 }
 0x13c   :  { %224 = sst [smem:[#allocation10 + $0x1]] %s264_s7 }
 0x15d   :  { %v229_v23 = vpop.xlane.xlu0 %228 }
 0x15e   :  { %v230_v24 = vrot.slane %v229_v23, 4 }
 0x160   :  { %v231_v25 = vadd.f32 %v230_v24, %v229_v23 }
 0x162   :  { %v232_v26 = vrot.slane %v231_v25, 2 }
 0x164   :  { %v233_v27 = vadd.f32 %v232_v26, %v231_v25 }
 0x166   :  { %v234_v28 = vrot.slane %v233_v27, 1 }
 0x168   :  { %v235_v29 = vadd.f32 %v234_v28, %v233_v27 }
 0x16a   :  { %265 = vpush %v235_v29 }
 0x19b   :  { %s266_s8 = spop %265 }
 0x19c   :  { %238 = sst [smem:[#allocation10 + $0x2]] %s266_s8 }
 0x19d   :  { %335 = shalt.err (!%p332_p4)
}
 0x19e   :  { %s348_s16 = smov [#allocation10]  }
 0x19f   :  { %248 = dma.smem_to_hbm %s348_s16, 16, %s402_s2, [#allocation7]  }
 0x1a0   :  { %340 = dma.done.wait [#allocation7], 16  }
 0x1a1   :  { %341 = vsyncadd [#allocation7], 4294967280 }
 0x1a2   :  { %252 = sfence }
 0x1a3   :  { %253 = vsyncpa [#allocation6], 1 }
 0x1a4   :  { %254 = vsyncpa [#allocation9], 1 }
 0x1a5   :  { %255 = vsyncpa [#allocation7], 1 }

</bundles_post_ra>
